<compile_context>
chip_gen: v7x
topology: tpu7x:2x2x1
jax: 0.10.0
libtpu: 0.0.40
codegen_flags: <defaults>
</compile_context>

<pallas_src>
import math

import jax
import jax.numpy as jnp
from jax.experimental import pallas as pl
from jax.experimental.pallas import tpu as pltpu


def _cast_kernel(x_ref, o_ref):
    # Elementwise dtype cast on the VPU; whole tile at once.
    o_ref[...] = x_ref[...].astype(jnp.float32)


_LANE_WIDTHS = (2048, 1024, 512, 256, 128)
_TARGET_OUT_TILE_BYTES = 8 << 20    # upper bound on f32 output bytes per grid step
_VMEM_FOOTPRINT_BUDGET = 24 << 20   # double-buffered in+out cap (safe on v7x 32 MiB scoped)
_VMEM_LIMIT_BYTES = 32 << 20        # explicit scoped-VMEM limit (v5e default is only 16 MiB)


def cast_to_float(x, *, min_pallas_bytes=8 << 20, max_rows_per_block=None):
    """Pallas implementation of `x.to(torch.float)` (cast to float32).

    min_pallas_bytes: only launch the Pallas kernel when total HBM traffic
        (input bytes + f32 output bytes) is at least this large; otherwise let
        XLA emit (and fuse) the convert.
    max_rows_per_block: optional cap on the row tile (testing / tuning hook).
    """
    if x.dtype == jnp.float32:
        return x

    n = math.prod(x.shape) if x.shape else 1
    itemsize = jnp.dtype(x.dtype).itemsize
    bytes_moved = n * (itemsize + 4)  # read input once, write f32 output once

    # Small tensors or element counts not a multiple of 128: a standalone
    # Pallas launch is overhead-dominated and prevents fusion into the
    # consumer — use the plain XLA convert.
    if bytes_moved < min_pallas_bytes or n % 128 != 0:
        return x.astype(jnp.float32)

    # Lane-dense slab: widest last dim (multiple of 128) dividing n exactly,
    # so the reshape is a free row-major re-view — no pad, no extra HBM pass.
    for width in _LANE_WIDTHS:
        if n % width == 0:
            break
    rows = n // width

    # Row tile: as large as possible subject to (a) ~8 MiB of f32 output per
    # step and (b) a 24 MiB double-buffered in+out VMEM footprint (v7x-safe).
    tr_from_out = _TARGET_OUT_TILE_BYTES // (width * 4)
    tr_from_vmem = _VMEM_FOOTPRINT_BUDGET // (2 * width * (itemsize + 4))
    tr = min(tr_from_out, tr_from_vmem)
    if max_rows_per_block is not None:
        tr = min(tr, max_rows_per_block)
    if tr >= rows:
        tr = rows  # single full-extent block (legal regardless of alignment)
    else:
        # Multiple of 32 sublanes so packed narrow dtypes (uint8 (32,128),
        # bf16 (16,128)) stay on native tiles for the full blocks; the masked
        # partial trailing block (if any) is handled by Pallas.
        tr = max(32, (tr // 32) * 32)

    grid = (pl.cdiv(rows, tr),)

    x2d = x.reshape(rows, width)  # row-major: free reshape, no data movement

    out2d = pl.pallas_call(
        _cast_kernel,
        out_shape=jax.ShapeDtypeStruct((rows, width), jnp.float32),
        grid=grid,
        in_specs=[pl.BlockSpec((tr, width), lambda i: (i, 0))],
        out_specs=pl.BlockSpec((tr, width), lambda i: (i, 0)),
        compiler_params=pltpu.CompilerParams(
            dimension_semantics=("parallel",),
            vmem_limit_bytes=_VMEM_LIMIT_BYTES,
        ),
        cost_estimate=pl.CostEstimate(
            flops=0, transcendentals=0, bytes_accessed=int(bytes_moved)
        ),
    )(x2d)

    return out2d.reshape(x.shape)


if __name__ == "__main__":
    key = jax.random.PRNGKey(0)
    k1, k2 = jax.random.split(key)

    # 1) Small DQN-style observation batch (module-consistent shape), forced
    #    through the Pallas kernel (single full-extent block, width=2048).
    x_small = jax.random.randint(k1, (2, 4, 16, 16), 0, 256, dtype=jnp.int32).astype(
        jnp.uint8
    )
    y_small = jax.block_until_ready(cast_to_float(x_small, min_pallas_bytes=0))
    assert y_small.dtype == jnp.float32
    assert y_small.shape == x_small.shape
    assert bool(jnp.all(y_small == x_small.astype(jnp.float32)))

    # 2) Same input through the default dispatch policy: bytes moved is far
    #    below the 8 MiB threshold, so this takes the fused-XLA-convert path.
    y_bypass = jax.block_until_ready(cast_to_float(x_small))
    assert y_bypass.dtype == jnp.float32
    assert bool(jnp.all(y_bypass == x_small.astype(jnp.float32)))

    # 3) Replay-minibatch-style uint8 frame stack forced through Pallas with a
    #    small row cap so the grid has multiple steps plus a masked partial
    #    trailing block (441 rows @ 32-row tiles -> 14 steps, last one partial).
    x_mid = jax.random.randint(k2, (8, 4, 84, 84), 0, 256, dtype=jnp.int32).astype(
        jnp.uint8
    )
    y_mid = jax.block_until_ready(
        cast_to_float(x_mid, min_pallas_bytes=0, max_rows_per_block=32)
    )
    assert y_mid.dtype == jnp.float32
    assert y_mid.shape == x_mid.shape
    assert bool(jnp.all(y_mid == x_mid.astype(jnp.float32)))

    print("KERNEL_OK")
</pallas_src>

<mosaic_0001>
module attributes {stable_mosaic.version = 11 : i64} {
  func.func @_cast_kernel(%arg0: i32, %arg1: memref<1x2048xi8, #tpu.memory_space<vmem>>, %arg2: memref<1x2048xf32, #tpu.memory_space<vmem>>) attributes {dimension_semantics = [#tpu.dimension_semantics<parallel>], iteration_bounds = array<i64: 1>, scalar_prefetch = 0 : i64, scratch_operands = 0 : i64, tpu.core_type = #tpu.core_type<tc>, window_params = [{transform_indices = @transform_0, window_bounds = array<i64: 1, 2048>}, {transform_indices = @transform_1, window_bounds = array<i64: 1, 2048>}]} {
    %c0 = arith.constant 0 : index
    %c0_0 = arith.constant 0 : index
    %0 = vector.load %arg1[%c0, %c0_0] : memref<1x2048xi8, #tpu.memory_space<vmem>>, vector<1x2048xi8>
    %1 = arith.uitofp %0 : vector<1x2048xi8> to vector<1x2048xf32>
    %c0_1 = arith.constant 0 : index
    %c0_2 = arith.constant 0 : index
    %2 = vector.load %arg2[%c0_1, %c0_2] : memref<1x2048xf32, #tpu.memory_space<vmem>>, vector<1x2048xf32>
    tpu.vector_store %arg2[%c0_1, %c0_2], %1 {strides = array<i32>} : memref<1x2048xf32, #tpu.memory_space<vmem>>, vector<1x2048xf32>,
    return
  }
  func.func @transform_0(%arg0: i32) -> (i32, i32) {
    %c0_i32 = arith.constant 0 : i32
    %c0_i32_0 = arith.constant 0 : i32
    return %arg0, %c0_i32 : i32, i32
  }
  func.func @transform_1(%arg0: i32) -> (i32, i32) {
    %c0_i32 = arith.constant 0 : i32
    %c0_i32_0 = arith.constant 0 : i32
    return %arg0, %c0_i32 : i32, i32
  }
}

</mosaic_0001>

<bundles_post_ra>
// kernel: tpu_custom_call.1
= control target key start
LH: loop header
LB: loop body
LE: loop exit
PB: predicated region body
PF: predicated region fallthrough
CT: control target
= control target key end

     0   :  { %6 = vsyncpa [#allocation3], 0  ;;  %s252_s0 = inlined_call_operand.hbm [shape: u8[1,2048], index: 0, kind: input, shape index: {}]   ;;  %s253_s1 = inlined_call_operand.hbm [shape: f32[1,2048], index: 1, kind: output, shape index: {}]  }
   0x1   :  { %7 = vsyncpa [#allocation4], 0  ;;  %s215_s6 = smov [#allocation2]   ;;  %s167_s10 = scalar_lea.hbm %s252_s0, 256 }
   0x2   :  { %s14_s7 = sshll.u32 %s215_s6, 4  ;;  %p168_p0 = scmp.ne.s32.totalorder %s252_s0, %s167_s10  ;;  %s15_s7 = int_to_ptr.vmem [resolvable:$true] %s14_s7 }
   0x3   :  { %p171_p1 = scmp.lt.u32.totalorder %s167_s10, %s252_s0 }
   0x5   :  { %p173_p2 = pnand %p171_p1, %p168_p0 }
   0x7   :  { %176 = shalt.err (!%p173_p2)
}
   0x8   :  { %s177_s15 = scalar_lea.vmem %s15_s7, 256  ;;  %p182_p4 = scmp.lt.s32.totalorder %s15_s7, %s15_s7 }
   0x9   :  { %p178_p3 = scmp.ne.s32.totalorder %s15_s7, %s177_s15  ;;  %p183_p5 = scmp.lt.s32.totalorder %s177_s15, %s177_s15 }
   0xb   :  { %p184_p6 = por %p183_p5, %p182_p4 }
   0xd   :  { %p185_p7 = pnand %p184_p6, %p178_p3 }
   0xf   :  { %188 = shalt.err (!%p185_p7)
}
  0x10   :  { %17 = dma.hbm_to_vmem [thread:$0]  %s252_s0, 256, %s15_s7, [#allocation3]  }
  0x11   :  { %211 = dma.done.wait [#allocation3], 256  }
  0x12   :  { %212 = vsyncadd [#allocation3], 4294967040  ;;  %v58_v0 = vlaneseq  ;;  %v216_v1 = vmov 1966171168   ;;  %v21_v5 = vld [vmem:[#allocation2] sm:$0xff]  ;;  %v22_v7 = vld [vmem:[#allocation2 + $0x8] sm:$0xff] }
  0x13   :  { %v56_v2 = vunpack.c.l.s4 %v216_v1  ;;  %v23_v8 = vunpack.c.0.s8 %v21_v5  ;;  %v24_v9 = vunpack.c.1.s8 %v21_v5  ;;  %v25_v10 = vunpack.c.2.s8 %v21_v5  ;;  %s217_s0 = smov [#allocation5]  }
  0x14   :  { %v59_v4 = vshrl.u32 %v58_v0, 7  ;;  %v26_v11 = vunpack.c.3.s8 %v21_v5  ;;  %v27_v12 = vunpack.c.0.s8 %v22_v7  ;;  %v28_v13 = vunpack.c.1.s8 %v22_v7  ;;  %s155_s18 = sshll.u32 %s217_s0, 4  ;;  %s156_s18 = int_to_ptr.vmem [resolvable:$true] %s155_s18 }
  0x15   :  { %v57_v3 = vunpack.c.0.s8 %v56_v2  ;;  %v29_v14 = vunpack.c.2.s8 %v22_v7  ;;  %v30_v15 = vunpack.c.3.s8 %v22_v7  ;;  %v31_v16 = vand.u32 255, %v23_v8  ;;  %s189_s19 = scalar_lea.vmem %s156_s18, 256  ;;  %p194_p9 = scmp.lt.s32.totalorder %s156_s18, %s156_s18 }
  0x16   :  { %v32_v17 = vand.u32 255, %v24_v9  ;;  %v33_v18 = vand.u32 255, %v25_v10  ;;  %v34_v19 = vand.u32 255, %v26_v11  ;;  %v35_v20 = vand.u32 255, %v27_v12  ;;  %p190_p8 = scmp.ne.s32.totalorder %s156_s18, %s189_s19  ;;  %p195_p10 = scmp.lt.s32.totalorder %s189_s19, %s189_s19 }
  0x17   :  { %v60_v6 = vsub.s32 %v57_v3, %v59_v4  ;;  %v36_v21 = vand.u32 255, %v28_v13  ;;  %v37_v22 = vand.u32 255, %v29_v14  ;;  %v38_v23 = vand.u32 255, %v30_v15 }
  0x18   :  { %v39_v24 = vcvt.s32.f32 %v31_v16  ;;  %v40_v25 = vcvt.s32.f32 %v32_v17  ;;  %v41_v26 = vcvt.s32.f32 %v33_v18  ;;  %v42_v27 = vcvt.s32.f32 %v34_v19  ;;  %p196_p11 = por %p195_p10, %p194_p9 }
  0x19   :  { %v43_v28 = vcvt.s32.f32 %v35_v20  ;;  %v44_v29 = vcvt.s32.f32 %v36_v21  ;;  %v45_v30 = vcvt.s32.f32 %v37_v22  ;;  %v46_v31 = vcvt.s32.f32 %v38_v23 }
  0x1a   :  { %v61_v32 = vrot.slane %v39_v24, %v60_v6  ;;  %v68_v33 = vrot.slane %v40_v25, %v60_v6  ;;  %v75_v34 = vrot.slane %v41_v26, %v60_v6  ;;  %v82_v35 = vrot.slane %v42_v27, %v60_v6  ;;  %p197_p12 = pnand %p196_p11, %p190_p8 }
  0x1b   :  { %v106_v36 = vrot.slane %v43_v28, %v60_v6  ;;  %v113_v37 = vrot.slane %v44_v29, %v60_v6  ;;  %v120_v38 = vrot.slane %v45_v30, %v60_v6  ;;  %v127_v39 = vrot.slane %v46_v31, %v60_v6 }
  0x1c   :  { %v83_v40 = vcombine.low %v61_v32, %v68_v33  ;;  %v84_v41 = vcombine.low %v75_v34, %v82_v35 }
  0x1d   :  { %v128_v42 = vcombine.low %v106_v36, %v113_v37  ;;  %v129_v43 = vcombine.low %v120_v38, %v127_v39 }
  0x1e   :  { %v91_v44 = vrot.slane %v83_v40, %v60_v6  ;;  %v98_v45 = vrot.slane %v84_v41, %v60_v6 }
  0x1f   :  { %v136_v46 = vrot.slane %v128_v42, %v60_v6  ;;  %v143_v47 = vrot.slane %v129_v43, %v60_v6 }
  0x20   :  { %v99_v48 = vcombine.low %v91_v44, %v98_v45 }
  0x21   :  { %v144_v49 = vcombine.low %v136_v46, %v143_v47 }
  0x22   :  { %147 = vst [vmem:[#allocation5] sm:$0xff] %v99_v48 }
  0x23   :  { %148 = vst [vmem:[#allocation5 + $0x8] sm:$0xff] %v144_v49 }
  0x24   :  { %200 = shalt.err (!%p197_p12)
}
  0x25   :  { %s201_s22 = scalar_lea.hbm %s253_s1, 256 }
  0x26   :  { %p202_p13 = scmp.ne.s32.totalorder %s253_s1, %s201_s22  ;;  %p205_p0 = scmp.lt.u32.totalorder %s201_s22, %s253_s1 }
  0x28   :  { %p207_p1 = pnand %p205_p0, %p202_p13 }
  0x2a   :  { %210 = shalt.err (!%p207_p1)
}
  0x2b   :  { %158 = dma.vmem_to_hbm [thread:$0]  %s156_s18, 256, %s253_s1, [#allocation4]  }
  0x2c   :  { %213 = dma.done.wait [#allocation4], 256  }
  0x2d   :  { %214 = vsyncadd [#allocation4], 4294967040 }
  0x2e   :  { %162 = vsyncpa [#allocation3], 1 }
  0x2f   :  { %163 = vsyncpa [#allocation4], 1 }

</bundles_post_ra>
